<compile_context>
chip_gen: v6e
topology: v6e:2x2x1
jax: 0.10.0
libtpu: 0.0.40
codegen_flags: <defaults>
</compile_context>

<pallas_src>
import functools

import jax
import jax.numpy as jnp
from jax import lax
from jax.experimental import pallas as pl
from jax.experimental.pallas import tpu as pltpu

# ---- model hyper-parameters (small, consistent with the module) ----
B = 2          # batch
T = 8          # sequence length (== block_size)
N_EMB = 32     # n_emb
N_HEAD = 4     # n_head
HEAD_SIZE = N_EMB // N_HEAD
LN_EPS = 1e-5
NEG_INF = -1e30   # finite additive mask value (avoids inf-arithmetic hazards)


def block_kernel(x_ref,
                 ln1w_ref, ln1b_ref,
                 wqkv_ref,
                 wproj_ref, bproj_ref,
                 ln2w_ref, ln2b_ref,
                 w1_ref, b1_ref, w2_ref, b2_ref,
                 chm_ref, amask_ref,
                 out_ref,
                 *, n_head):
    x = x_ref[...]                                   # (N, C) f32, N = B*T
    n, c = x.shape

    # ---------------- LayerNorm 1 (f32) ----------------
    mu = jnp.mean(x, axis=-1, keepdims=True)
    var = jnp.mean((x - mu) ** 2, axis=-1, keepdims=True)
    h = (x - mu) * lax.rsqrt(var + LN_EPS) * ln1w_ref[0] + ln1b_ref[0]

    # ---------------- fused Q/K/V projection (one wide bf16 MXU push) -------
    # Attention scale is already folded into the Q columns of wqkv host-side.
    qkv = jnp.dot(h.astype(jnp.bfloat16), wqkv_ref[...],
                  preferred_element_type=jnp.float32)          # (N, 3C) f32
    q = qkv[:, :c]
    k = qkv[:, c:2 * c]
    v = qkv[:, 2 * c:]

    # ---------------- flat-head self-attention (2 MXU pushes total) ---------
    chm = chm_ref[...]                               # (NH*N, C) 0/1 head mask
    # Tile q over NH head row-blocks and zero the other heads' channels.
    qh = jnp.concatenate([q] * n_head, axis=0) * chm             # (NH*N, C)

    # Scores for ALL heads in one matmul; k left unmasked (qh already masked).
    s = lax.dot_general(qh.astype(jnp.bfloat16), k.astype(jnp.bfloat16),
                        dimension_numbers=(((1,), (1,)), ((), ())),
                        preferred_element_type=jnp.float32)      # (NH*N, N)
    s = s + amask_ref[...]                       # block-diag causal (additive)
    s = s - jnp.max(s, axis=-1, keepdims=True)
    e = jnp.exp(s)
    p = e * pl.reciprocal(jnp.sum(e, axis=-1, keepdims=True), approx=True)

    # Attention output for ALL heads in one matmul, then recombine heads by a
    # channel-masked sum over the NH row blocks (static, tile-aligned slices).
    o = jnp.dot(p.astype(jnp.bfloat16), v.astype(jnp.bfloat16),
                preferred_element_type=jnp.float32)              # (NH*N, C)
    om = o * chm
    attn = om[0:n]
    for hh in range(1, n_head):
        attn = attn + om[hh * n:(hh + 1) * n]                    # (N, C)

    attn = jnp.dot(attn.astype(jnp.bfloat16), wproj_ref[...],
                   preferred_element_type=jnp.float32) + bproj_ref[0]

    x1 = x + attn                    # first residual (f32)

    # ---------------- LayerNorm 2 (f32) + FeedForward (bf16 matmuls) --------
    mu2 = jnp.mean(x1, axis=-1, keepdims=True)
    var2 = jnp.mean((x1 - mu2) ** 2, axis=-1, keepdims=True)
    h2 = (x1 - mu2) * lax.rsqrt(var2 + LN_EPS) * ln2w_ref[0] + ln2b_ref[0]

    f = jnp.dot(h2.astype(jnp.bfloat16), w1_ref[...],
                preferred_element_type=jnp.float32) + b1_ref[0]
    f = jnp.maximum(f, 0.0)          # ReLU
    f = jnp.dot(f.astype(jnp.bfloat16), w2_ref[...],
                preferred_element_type=jnp.float32) + b2_ref[0]

    out_ref[...] = (x1 + f).astype(out_ref.dtype)


def transformer_block(x, params):
    """x: (B, T, C) float32.  params: dict of f32 weights (see make_params)."""
    b, t, c = x.shape
    n = b * t
    hidden = 4 * c
    nh = N_HEAD
    hs = c // nh

    # Fused QKV weight (C, 3C), attention scale folded into Q, stored bf16.
    scale = float(c) ** (-0.5)   # PyTorch Head scales by n_embed ** -0.5
    wqkv = jnp.concatenate(
        [params["wq"] * scale, params["wk"], params["wv"]],
        axis=1).astype(jnp.bfloat16)
    wproj = params["wproj"].astype(jnp.bfloat16)
    w1 = params["w1"].astype(jnp.bfloat16)
    w2 = params["w2"].astype(jnp.bfloat16)

    # Precomputed constant masks (hoisted out of the kernel body).
    head_of_ch = jnp.arange(c, dtype=jnp.int32) // hs                 # (C,)
    head_of_row = jnp.arange(nh * n, dtype=jnp.int32) // n            # (NH*N,)
    chm = (head_of_row[:, None] == head_of_ch[None, :]).astype(jnp.float32)

    r = jnp.arange(n, dtype=jnp.int32)
    valid = (((r[:, None] // t) == (r[None, :] // t)) &
             ((r[None, :] % t) <= (r[:, None] % t)))
    amask = jnp.where(valid, 0.0, NEG_INF).astype(jnp.float32)        # (N, N)
    amask = jnp.tile(amask, (nh, 1))                                  # (NH*N, N)

    full = lambda shape: pl.BlockSpec(shape, lambda i: (0,) * len(shape))
    kernel = functools.partial(block_kernel, n_head=nh)

    out2d = pl.pallas_call(
        kernel,
        out_shape=jax.ShapeDtypeStruct((n, c), x.dtype),
        grid_spec=pltpu.PrefetchScalarGridSpec(
            num_scalar_prefetch=0,
            grid=(1,),                                    # single step; see header
            in_specs=[
                full((n, c)),                             # x (flattened B*T rows)
                full((1, c)), full((1, c)),               # ln1 w, b
                full((c, 3 * c)),                         # fused wqkv (bf16)
                full((c, c)), full((1, c)),               # proj w (bf16), b
                full((1, c)), full((1, c)),               # ln2 w, b
                full((c, hidden)), full((1, hidden)),     # ffn w1 (bf16), b1
                full((hidden, c)), full((1, c)),          # ffn w2 (bf16), b2
                full((nh * n, c)),                        # head channel mask
                full((nh * n, n)),                        # additive causal mask
            ],
            out_specs=full((n, c)),
        ),
        compiler_params=pltpu.CompilerParams(
            dimension_semantics=("arbitrary",)),
    )(x.reshape(n, c),
      params["ln1_w"], params["ln1_b"],
      wqkv,
      wproj, params["bproj"],
      params["ln2_w"], params["ln2_b"],
      w1, params["b1"], w2, params["b2"],
      chm, amask)

    return out2d.reshape(b, t, c)


def make_params(key, c):
    hidden = 4 * c
    ks = jax.random.split(key, 8)
    scale = 0.02
    return {
        "ln1_w": jnp.ones((1, c), jnp.float32),
        "ln1_b": jnp.zeros((1, c), jnp.float32),
        "ln2_w": jnp.ones((1, c), jnp.float32),
        "ln2_b": jnp.zeros((1, c), jnp.float32),
        "wq": scale * jax.random.normal(ks[0], (c, c), jnp.float32),
        "wk": scale * jax.random.normal(ks[1], (c, c), jnp.float32),
        "wv": scale * jax.random.normal(ks[2], (c, c), jnp.float32),
        "wproj": scale * jax.random.normal(ks[3], (c, c), jnp.float32),
        "bproj": scale * jax.random.normal(ks[4], (1, c), jnp.float32),
        "w1": scale * jax.random.normal(ks[5], (c, hidden), jnp.float32),
        "b1": jnp.zeros((1, hidden), jnp.float32),
        "w2": scale * jax.random.normal(ks[6], (hidden, c), jnp.float32),
        "b2": jnp.zeros((1, c), jnp.float32),
    }


def reference_block(x, p):
    """Pure-JAX f32 reference matching the PyTorch Block in eval mode."""
    def ln(z, w, b):
        mu = jnp.mean(z, axis=-1, keepdims=True)
        var = jnp.mean((z - mu) ** 2, axis=-1, keepdims=True)
        return (z - mu) * lax.rsqrt(var + LN_EPS) * w + b

    bsz, t, c = x.shape
    h = ln(x, p["ln1_w"][0], p["ln1_b"][0])
    q = h @ p["wq"]; k = h @ p["wk"]; v = h @ p["wv"]
    outs = []
    mask = jnp.tril(jnp.ones((t, t), bool))
    for hi in range(N_HEAD):
        sl = slice(hi * HEAD_SIZE, (hi + 1) * HEAD_SIZE)
        w = jnp.einsum("btd,bsd->bts", q[..., sl], k[..., sl]) * (c ** -0.5)
        w = jnp.where(mask, w, -jnp.inf)
        w = jax.nn.softmax(w, axis=-1)
        outs.append(jnp.einsum("bts,bsd->btd", w, v[..., sl]))
    attn = jnp.concatenate(outs, axis=-1) @ p["wproj"] + p["bproj"][0]
    x1 = x + attn
    h2 = ln(x1, p["ln2_w"][0], p["ln2_b"][0])
    f = jnp.maximum(h2 @ p["w1"] + p["b1"][0], 0.0) @ p["w2"] + p["b2"][0]
    return x1 + f


if __name__ == "__main__":
    key = jax.random.PRNGKey(0)
    kx, kp = jax.random.split(key)
    x = jax.random.normal(kx, (B, T, N_EMB), jnp.float32)
    params = make_params(kp, N_EMB)

    out = transformer_block(x, params)
    out = jax.block_until_ready(out)

    ref = reference_block(x, params)
    assert out.shape == (B, T, N_EMB)
    # Tolerance covers bf16 MXU operands (f32 accumulation) and the EUP
    # approximate-reciprocal softmax denominator vs. the f32 reference.
    assert jnp.allclose(out, ref, atol=1e-2, rtol=1e-2), "mismatch vs reference"

    print("KERNEL_OK")
</pallas_src>

<mosaic_0001>
module attributes {stable_mosaic.version = 11 : i64} {
  func.func @block_kernel(%arg0: i32, %arg1: memref<16x32xf32, #tpu.memory_space<vmem>>, %arg2: memref<1x32xf32, #tpu.memory_space<vmem>>, %arg3: memref<1x32xf32, #tpu.memory_space<vmem>>, %arg4: memref<32x96xbf16, #tpu.memory_space<vmem>>, %arg5: memref<32x32xbf16, #tpu.memory_space<vmem>>, %arg6: memref<1x32xf32, #tpu.memory_space<vmem>>, %arg7: memref<1x32xf32, #tpu.memory_space<vmem>>, %arg8: memref<1x32xf32, #tpu.memory_space<vmem>>, %arg9: memref<32x128xbf16, #tpu.memory_space<vmem>>, %arg10: memref<1x128xf32, #tpu.memory_space<vmem>>, %arg11: memref<128x32xbf16, #tpu.memory_space<vmem>>, %arg12: memref<1x32xf32, #tpu.memory_space<vmem>>, %arg13: memref<64x32xf32, #tpu.memory_space<vmem>>, %arg14: memref<64x16xf32, #tpu.memory_space<vmem>>, %arg15: memref<16x32xf32, #tpu.memory_space<vmem>>) attributes {dimension_semantics = [#tpu.dimension_semantics<arbitrary>], iteration_bounds = array<i64: 1>, scalar_prefetch = 0 : i64, scratch_operands = 0 : i64, tpu.core_type = #tpu.core_type<tc>, window_params = [{pipeline_mode = #tpu.pipeline_mode<synchronous>, transform_indices = @transform_0, window_bounds = array<i64: 16, 32>}, {pipeline_mode = #tpu.pipeline_mode<synchronous>, transform_indices = @transform_1, window_bounds = array<i64: 1, 32>}, {pipeline_mode = #tpu.pipeline_mode<synchronous>, transform_indices = @transform_2, window_bounds = array<i64: 1, 32>}, {pipeline_mode = #tpu.pipeline_mode<synchronous>, transform_indices = @transform_3, window_bounds = array<i64: 32, 96>}, {pipeline_mode = #tpu.pipeline_mode<synchronous>, transform_indices = @transform_4, window_bounds = array<i64: 32, 32>}, {pipeline_mode = #tpu.pipeline_mode<synchronous>, transform_indices = @transform_5, window_bounds = array<i64: 1, 32>}, {pipeline_mode = #tpu.pipeline_mode<synchronous>, transform_indices = @transform_6, window_bounds = array<i64: 1, 32>}, {pipeline_mode = #tpu.pipeline_mode<synchronous>, transform_indices = @transform_7, window_bounds = array<i64: 1, 32>}, {pipeline_mode = #tpu.pipeline_mode<synchronous>, transform_indices = @transform_8, window_bounds = array<i64: 32, 128>}, {pipeline_mode = #tpu.pipeline_mode<synchronous>, transform_indices = @transform_9, window_bounds = array<i64: 1, 128>}, {pipeline_mode = #tpu.pipeline_mode<synchronous>, transform_indices = @transform_10, window_bounds = array<i64: 128, 32>}, {pipeline_mode = #tpu.pipeline_mode<synchronous>, transform_indices = @transform_11, window_bounds = array<i64: 1, 32>}, {pipeline_mode = #tpu.pipeline_mode<synchronous>, transform_indices = @transform_12, window_bounds = array<i64: 64, 32>}, {pipeline_mode = #tpu.pipeline_mode<synchronous>, transform_indices = @transform_13, window_bounds = array<i64: 64, 16>}, {pipeline_mode = #tpu.pipeline_mode<synchronous>, transform_indices = @transform_14, window_bounds = array<i64: 16, 32>}]} {
    %c0 = arith.constant 0 : index
    %c0_0 = arith.constant 0 : index
    %0 = vector.load %arg1[%c0, %c0_0] : memref<16x32xf32, #tpu.memory_space<vmem>>, vector<16x32xf32>
    %cst = arith.constant dense<0.000000e+00> : vector<16xf32>
    %1 = vector.multi_reduction <add>, %0, %cst [1] : vector<16x32xf32> to vector<16xf32>
    %2 = vector.shape_cast %1 : vector<16xf32> to vector<16x1xf32>
    %cst_1 = arith.constant 3.200000e+01 : f32
    %3 = vector.broadcast %cst_1 : f32 to vector<16x1xf32>
    %4 = arith.divf %2, %3 : vector<16x1xf32>
    %5 = vector.broadcast %4 : vector<16x1xf32> to vector<16x32xf32>
    %6 = arith.subf %0, %5 : vector<16x32xf32>
    %7 = arith.mulf %6, %6 : vector<16x32xf32>
    %cst_2 = arith.constant dense<0.000000e+00> : vector<16xf32>
    %8 = vector.multi_reduction <add>, %7, %cst_2 [1] : vector<16x32xf32> to vector<16xf32>
    %9 = vector.shape_cast %8 : vector<16xf32> to vector<16x1xf32>
    %cst_3 = arith.constant 3.200000e+01 : f32
    %10 = vector.broadcast %cst_3 : f32 to vector<16x1xf32>
    %11 = arith.divf %9, %10 : vector<16x1xf32>
    %12 = vector.broadcast %4 : vector<16x1xf32> to vector<16x32xf32>
    %13 = arith.subf %0, %12 : vector<16x32xf32>
    %cst_4 = arith.constant 9.99999974E-6 : f32
    %14 = vector.broadcast %cst_4 : f32 to vector<16x1xf32>
    %15 = arith.addf %11, %14 : vector<16x1xf32>
    %16 = math.rsqrt %15 : vector<16x1xf32>
    %17 = vector.broadcast %16 : vector<16x1xf32> to vector<16x32xf32>
    %18 = arith.mulf %13, %17 : vector<16x32xf32>
    %c0_5 = arith.constant 0 : index
    %c0_6 = arith.constant 0 : index
    %19 = vector.load %arg2[%c0_5, %c0_6] : memref<1x32xf32, #tpu.memory_space<vmem>>, vector<1x32xf32>
    %20 = vector.shape_cast %19 : vector<1x32xf32> to vector<32xf32>
    %21 = vector.shape_cast %20 : vector<32xf32> to vector<1x32xf32>
    %22 = vector.broadcast %21 : vector<1x32xf32> to vector<16x32xf32>
    %23 = arith.mulf %18, %22 : vector<16x32xf32>
    %c0_7 = arith.constant 0 : index
    %c0_8 = arith.constant 0 : index
    %24 = vector.load %arg3[%c0_7, %c0_8] : memref<1x32xf32, #tpu.memory_space<vmem>>, vector<1x32xf32>
    %25 = vector.shape_cast %24 : vector<1x32xf32> to vector<32xf32>
    %26 = vector.shape_cast %25 : vector<32xf32> to vector<1x32xf32>
    %27 = vector.broadcast %26 : vector<1x32xf32> to vector<16x32xf32>
    %28 = arith.addf %23, %27 : vector<16x32xf32>
    %29 = arith.truncf %28 : vector<16x32xf32> to vector<16x32xbf16>
    %c0_9 = arith.constant 0 : index
    %c0_10 = arith.constant 0 : index
    %30 = vector.load %arg4[%c0_9, %c0_10] : memref<32x96xbf16, #tpu.memory_space<vmem>>, vector<32x96xbf16>
    %cst_11 = arith.constant dense<0.000000e+00> : vector<16x96xf32>
    %31 = tpu.matmul %29, %30, %cst_11 {dimension_numbers = #tpu.dot_dimension_numbers<[1], [0], [0], [1], [0, 0, 1, 1], [], []>} : vector<16x32xbf16>, vector<32x96xbf16>, vector<16x96xf32> -> vector<16x96xf32>
    %32 = vector.extract_strided_slice %31 {offsets = [0, 0], sizes = [16, 32], strides = [1, 1]} : vector<16x96xf32> to vector<16x32xf32>
    %33 = vector.extract_strided_slice %31 {offsets = [0, 32], sizes = [16, 32], strides = [1, 1]} : vector<16x96xf32> to vector<16x32xf32>
    %34 = vector.extract_strided_slice %31 {offsets = [0, 64], sizes = [16, 32], strides = [1, 1]} : vector<16x96xf32> to vector<16x32xf32>
    %c0_12 = arith.constant 0 : index
    %c0_13 = arith.constant 0 : index
    %35 = vector.load %arg13[%c0_12, %c0_13] : memref<64x32xf32, #tpu.memory_space<vmem>>, vector<64x32xf32>
    %36 = tpu.concatenate %32, %32, %32, %32 in 0 : vector<16x32xf32>, vector<16x32xf32>, vector<16x32xf32>, vector<16x32xf32> -> vector<64x32xf32>
    %37 = arith.mulf %36, %35 : vector<64x32xf32>
    %38 = arith.truncf %37 : vector<64x32xf32> to vector<64x32xbf16>
    %39 = arith.truncf %33 : vector<16x32xf32> to vector<16x32xbf16>
    %cst_14 = arith.constant dense<0.000000e+00> : vector<64x16xf32>
    %40 = tpu.matmul %38, %39, %cst_14 {dimension_numbers = #tpu.dot_dimension_numbers<[1], [1], [0], [0], [0, 0, 1, 0], [], []>} : vector<64x32xbf16>, vector<16x32xbf16>, vector<64x16xf32> -> vector<64x16xf32>
    %c0_15 = arith.constant 0 : index
    %c0_16 = arith.constant 0 : index
    %41 = vector.load %arg14[%c0_15, %c0_16] : memref<64x16xf32, #tpu.memory_space<vmem>>, vector<64x16xf32>
    %42 = arith.addf %40, %41 : vector<64x16xf32>
    %cst_17 = arith.constant dense<0xFF800000> : vector<64xf32>
    %43 = vector.multi_reduction <maximumf>, %42, %cst_17 [1] : vector<64x16xf32> to vector<64xf32>
    %44 = vector.shape_cast %43 : vector<64xf32> to vector<64x1xf32>
    %45 = vector.broadcast %44 : vector<64x1xf32> to vector<64x16xf32>
    %46 = arith.subf %42, %45 : vector<64x16xf32>
    %47 = math.exp %46 : vector<64x16xf32>
    %cst_18 = arith.constant dense<0.000000e+00> : vector<64xf32>
    %48 = vector.multi_reduction <add>, %47, %cst_18 [1] : vector<64x16xf32> to vector<64xf32>
    %49 = vector.shape_cast %48 : vector<64xf32> to vector<64x1xf32>
    %50 = tpu.reciprocal %49 {approx = true} : vector<64x1xf32> -> vector<64x1xf32>
    %51 = vector.broadcast %50 : vector<64x1xf32> to vector<64x16xf32>
    %52 = arith.mulf %47, %51 : vector<64x16xf32>
    %53 = arith.truncf %52 : vector<64x16xf32> to vector<64x16xbf16>
    %54 = arith.truncf %34 : vector<16x32xf32> to vector<16x32xbf16>
    %cst_19 = arith.constant dense<0.000000e+00> : vector<64x32xf32>
    %55 = tpu.matmul %53, %54, %cst_19 {dimension_numbers = #tpu.dot_dimension_numbers<[1], [0], [0], [1], [0, 0, 1, 1], [], []>} : vector<64x16xbf16>, vector<16x32xbf16>, vector<64x32xf32> -> vector<64x32xf32>
    %56 = arith.mulf %55, %35 : vector<64x32xf32>
    %57 = vector.extract_strided_slice %56 {offsets = [0, 0], sizes = [16, 32], strides = [1, 1]} : vector<64x32xf32> to vector<16x32xf32>
    %58 = vector.extract_strided_slice %56 {offsets = [16, 0], sizes = [16, 32], strides = [1, 1]} : vector<64x32xf32> to vector<16x32xf32>
    %59 = arith.addf %57, %58 : vector<16x32xf32>
    %60 = vector.extract_strided_slice %56 {offsets = [32, 0], sizes = [16, 32], strides = [1, 1]} : vector<64x32xf32> to vector<16x32xf32>
    %61 = arith.addf %59, %60 : vector<16x32xf32>
    %62 = vector.extract_strided_slice %56 {offsets = [48, 0], sizes = [16, 32], strides = [1, 1]} : vector<64x32xf32> to vector<16x32xf32>
    %63 = arith.addf %61, %62 : vector<16x32xf32>
    %64 = arith.truncf %63 : vector<16x32xf32> to vector<16x32xbf16>
    %c0_20 = arith.constant 0 : index
    %c0_21 = arith.constant 0 : index
    %65 = vector.load %arg5[%c0_20, %c0_21] : memref<32x32xbf16, #tpu.memory_space<vmem>>, vector<32x32xbf16>
    %cst_22 = arith.constant dense<0.000000e+00> : vector<16x32xf32>
    %66 = tpu.matmul %64, %65, %cst_22 {dimension_numbers = #tpu.dot_dimension_numbers<[1], [0], [0], [1], [0, 0, 1, 1], [], []>} : vector<16x32xbf16>, vector<32x32xbf16>, vector<16x32xf32> -> vector<16x32xf32>
    %c0_23 = arith.constant 0 : index
    %c0_24 = arith.constant 0 : index
    %67 = vector.load %arg6[%c0_23, %c0_24] : memref<1x32xf32, #tpu.memory_space<vmem>>, vector<1x32xf32>
    %68 = vector.shape_cast %67 : vector<1x32xf32> to vector<32xf32>
    %69 = vector.shape_cast %68 : vector<32xf32> to vector<1x32xf32>
    %70 = vector.broadcast %69 : vector<1x32xf32> to vector<16x32xf32>
    %71 = arith.addf %66, %70 : vector<16x32xf32>
    %72 = arith.addf %0, %71 : vector<16x32xf32>
    %cst_25 = arith.constant dense<0.000000e+00> : vector<16xf32>
    %73 = vector.multi_reduction <add>, %72, %cst_25 [1] : vector<16x32xf32> to vector<16xf32>
    %74 = vector.shape_cast %73 : vector<16xf32> to vector<16x1xf32>
    %cst_26 = arith.constant 3.200000e+01 : f32
    %75 = vector.broadcast %cst_26 : f32 to vector<16x1xf32>
    %76 = arith.divf %74, %75 : vector<16x1xf32>
    %77 = vector.broadcast %76 : vector<16x1xf32> to vector<16x32xf32>
    %78 = arith.subf %72, %77 : vector<16x32xf32>
    %79 = arith.mulf %78, %78 : vector<16x32xf32>
    %cst_27 = arith.constant dense<0.000000e+00> : vector<16xf32>
    %80 = vector.multi_reduction <add>, %79, %cst_27 [1] : vector<16x32xf32> to vector<16xf32>
    %81 = vector.shape_cast %80 : vector<16xf32> to vector<16x1xf32>
    %cst_28 = arith.constant 3.200000e+01 : f32
    %82 = vector.broadcast %cst_28 : f32 to vector<16x1xf32>
    %83 = arith.divf %81, %82 : vector<16x1xf32>
    %84 = vector.broadcast %76 : vector<16x1xf32> to vector<16x32xf32>
    %85 = arith.subf %72, %84 : vector<16x32xf32>
    %cst_29 = arith.constant 9.99999974E-6 : f32
    %86 = vector.broadcast %cst_29 : f32 to vector<16x1xf32>
    %87 = arith.addf %83, %86 : vector<16x1xf32>
    %88 = math.rsqrt %87 : vector<16x1xf32>
    %89 = vector.broadcast %88 : vector<16x1xf32> to vector<16x32xf32>
    %90 = arith.mulf %85, %89 : vector<16x32xf32>
    %c0_30 = arith.constant 0 : index
    %c0_31 = arith.constant 0 : index
    %91 = vector.load %arg7[%c0_30, %c0_31] : memref<1x32xf32, #tpu.memory_space<vmem>>, vector<1x32xf32>
    %92 = vector.shape_cast %91 : vector<1x32xf32> to vector<32xf32>
    %93 = vector.shape_cast %92 : vector<32xf32> to vector<1x32xf32>
    %94 = vector.broadcast %93 : vector<1x32xf32> to vector<16x32xf32>
    %95 = arith.mulf %90, %94 : vector<16x32xf32>
    %c0_32 = arith.constant 0 : index
    %c0_33 = arith.constant 0 : index
    %96 = vector.load %arg8[%c0_32, %c0_33] : memref<1x32xf32, #tpu.memory_space<vmem>>, vector<1x32xf32>
    %97 = vector.shape_cast %96 : vector<1x32xf32> to vector<32xf32>
    %98 = vector.shape_cast %97 : vector<32xf32> to vector<1x32xf32>
    %99 = vector.broadcast %98 : vector<1x32xf32> to vector<16x32xf32>
    %100 = arith.addf %95, %99 : vector<16x32xf32>
    %101 = arith.truncf %100 : vector<16x32xf32> to vector<16x32xbf16>
    %c0_34 = arith.constant 0 : index
    %c0_35 = arith.constant 0 : index
    %102 = vector.load %arg9[%c0_34, %c0_35] : memref<32x128xbf16, #tpu.memory_space<vmem>>, vector<32x128xbf16>
    %cst_36 = arith.constant dense<0.000000e+00> : vector<16x128xf32>
    %103 = tpu.matmul %101, %102, %cst_36 {dimension_numbers = #tpu.dot_dimension_numbers<[1], [0], [0], [1], [0, 0, 1, 1], [], []>} : vector<16x32xbf16>, vector<32x128xbf16>, vector<16x128xf32> -> vector<16x128xf32>
    %c0_37 = arith.constant 0 : index
    %c0_38 = arith.constant 0 : index
    %104 = vector.load %arg10[%c0_37, %c0_38] : memref<1x128xf32, #tpu.memory_space<vmem>>, vector<1x128xf32>
    %105 = vector.shape_cast %104 : vector<1x128xf32> to vector<128xf32>
    %106 = vector.shape_cast %105 : vector<128xf32> to vector<1x128xf32>
    %107 = vector.broadcast %106 : vector<1x128xf32> to vector<16x128xf32>
    %108 = arith.addf %103, %107 : vector<16x128xf32>
    %cst_39 = arith.constant 0.000000e+00 : f32
    %109 = vector.broadcast %cst_39 : f32 to vector<16x128xf32>
    %110 = arith.maximumf %108, %109 : vector<16x128xf32>
    %111 = arith.truncf %110 : vector<16x128xf32> to vector<16x128xbf16>
    %c0_40 = arith.constant 0 : index
    %c0_41 = arith.constant 0 : index
    %112 = vector.load %arg11[%c0_40, %c0_41] : memref<128x32xbf16, #tpu.memory_space<vmem>>, vector<128x32xbf16>
    %cst_42 = arith.constant dense<0.000000e+00> : vector<16x32xf32>
    %113 = tpu.matmul %111, %112, %cst_42 {dimension_numbers = #tpu.dot_dimension_numbers<[1], [0], [0], [1], [0, 0, 1, 1], [], []>} : vector<16x128xbf16>, vector<128x32xbf16>, vector<16x32xf32> -> vector<16x32xf32>
    %c0_43 = arith.constant 0 : index
    %c0_44 = arith.constant 0 : index
    %114 = vector.load %arg12[%c0_43, %c0_44] : memref<1x32xf32, #tpu.memory_space<vmem>>, vector<1x32xf32>
    %115 = vector.shape_cast %114 : vector<1x32xf32> to vector<32xf32>
    %116 = vector.shape_cast %115 : vector<32xf32> to vector<1x32xf32>
    %117 = vector.broadcast %116 : vector<1x32xf32> to vector<16x32xf32>
    %118 = arith.addf %113, %117 : vector<16x32xf32>
    %119 = arith.addf %72, %118 : vector<16x32xf32>
    %c0_45 = arith.constant 0 : index
    %c0_46 = arith.constant 0 : index
    %120 = vector.load %arg15[%c0_45, %c0_46] : memref<16x32xf32, #tpu.memory_space<vmem>>, vector<16x32xf32>
    tpu.vector_store %arg15[%c0_45, %c0_46], %119 {strides = array<i32>} : memref<16x32xf32, #tpu.memory_space<vmem>>, vector<16x32xf32>,
    return
  }
  func.func @transform_0(%arg0: i32) -> (i32, i32) {
    %c0_i32 = arith.constant 0 : i32
    %c0_i32_0 = arith.constant 0 : i32
    %c0_i32_1 = arith.constant 0 : i32
    return %c0_i32, %c0_i32_0 : i32, i32
  }
  func.func @transform_1(%arg0: i32) -> (i32, i32) {
    %c0_i32 = arith.constant 0 : i32
    %c0_i32_0 = arith.constant 0 : i32
    %c0_i32_1 = arith.constant 0 : i32
    return %c0_i32, %c0_i32_0 : i32, i32
  }
  func.func @transform_2(%arg0: i32) -> (i32, i32) {
    %c0_i32 = arith.constant 0 : i32
    %c0_i32_0 = arith.constant 0 : i32
    %c0_i32_1 = arith.constant 0 : i32
    return %c0_i32, %c0_i32_0 : i32, i32
  }
  func.func @transform_3(%arg0: i32) -> (i32, i32) {
    %c0_i32 = arith.constant 0 : i32
    %c0_i32_0 = arith.constant 0 : i32
    %c0_i32_1 = arith.constant 0 : i32
    return %c0_i32, %c0_i32_0 : i32, i32
  }
  func.func @transform_4(%arg0: i32) -> (i32, i32) {
    %c0_i32 = arith.constant 0 : i32
    %c0_i32_0 = arith.constant 0 : i32
    %c0_i32_1 = arith.constant 0 : i32
    return %c0_i32, %c0_i32_0 : i32, i32
  }
  func.func @transform_5(%arg0: i32) -> (i32, i32) {
    %c0_i32 = arith.constant 0 : i32
    %c0_i32_0 = arith.constant 0 : i32
    %c0_i32_1 = arith.constant 0 : i32
    return %c0_i32, %c0_i32_0 : i32, i32
  }
  func.func @transform_6(%arg0: i32) -> (i32, i32) {
    %c0_i32 = arith.constant 0 : i32
    %c0_i32_0 = arith.constant 0 : i32
    %c0_i32_1 = arith.constant 0 : i32
    return %c0_i32, %c0_i32_0 : i32, i32
  }
  func.func @transform_7(%arg0: i32) -> (i32, i32) {
    %c0_i32 = arith.constant 0 : i32
    %c0_i32_0 = arith.constant 0 : i32
    %c0_i32_1 = arith.constant 0 : i32
    return %c0_i32, %c0_i32_0 : i32, i32
  }
  func.func @transform_8(%arg0: i32) -> (i32, i32) {
    %c0_i32 = arith.constant 0 : i32
    %c0_i32_0 = arith.constant 0 : i32
    %c0_i32_1 = arith.constant 0 : i32
    return %c0_i32, %c0_i32_0 : i32, i32
  }
  func.func @transform_9(%arg0: i32) -> (i32, i32) {
    %c0_i32 = arith.constant 0 : i32
    %c0_i32_0 = arith.constant 0 : i32
    %c0_i32_1 = arith.constant 0 : i32
    return %c0_i32, %c0_i32_0 : i32, i32
  }
  func.func @transform_10(%arg0: i32) -> (i32, i32) {
    %c0_i32 = arith.constant 0 : i32
    %c0_i32_0 = arith.constant 0 : i32
    %c0_i32_1 = arith.constant 0 : i32
    return %c0_i32, %c0_i32_0 : i32, i32
  }
  func.func @transform_11(%arg0: i32) -> (i32, i32) {
    %c0_i32 = arith.constant 0 : i32
    %c0_i32_0 = arith.constant 0 : i32
    %c0_i32_1 = arith.constant 0 : i32
    return %c0_i32, %c0_i32_0 : i32, i32
  }
  func.func @transform_12(%arg0: i32) -> (i32, i32) {
    %c0_i32 = arith.constant 0 : i32
    %c0_i32_0 = arith.constant 0 : i32
    %c0_i32_1 = arith.constant 0 : i32
    return %c0_i32, %c0_i32_0 : i32, i32
  }
  func.func @transform_13(%arg0: i32) -> (i32, i32) {
    %c0_i32 = arith.constant 0 : i32
    %c0_i32_0 = arith.constant 0 : i32
    %c0_i32_1 = arith.constant 0 : i32
    return %c0_i32, %c0_i32_0 : i32, i32
  }
  func.func @transform_14(%arg0: i32) -> (i32, i32) {
    %c0_i32 = arith.constant 0 : i32
    %c0_i32_0 = arith.constant 0 : i32
    %c0_i32_1 = arith.constant 0 : i32
    return %c0_i32, %c0_i32_0 : i32, i32
  }
}

</mosaic_0001>

<bundles_post_ra>
// kernel: tpu_custom_call.1
= control target key start
LH: loop header
LB: loop body
LE: loop exit
PB: predicated region body
PF: predicated region fallthrough
CT: control target
= control target key end

     0   :  { %vm51_vm0 = vcmask 261120   ;;  %s1305_s0 = inlined_call_operand.vmem [shape: f32[16,32], index: 0, kind: input, shape index: {}]   ;;  %s1306_s1 = inlined_call_operand.vmem [shape: f32[1,32], index: 1, kind: input, shape index: {}]   ;;  %s1307_s2 = inlined_call_operand.vmem [shape: f32[1,32], index: 2, kind: input, shape index: {}]   ;;  %s1308_s3 = inlined_call_operand.vmem [shape: bf16[32,96], index: 3, kind: input, shape index: {}]   ;;  %s1309_s4 = inlined_call_operand.vmem [shape: bf16[32,32], index: 4, kind: input, shape index: {}]   ;;  %s1310_s5 = inlined_call_operand.vmem [shape: f32[1,32], index: 5, kind: input, shape index: {}]   ;;  %s1311_s6 = inlined_call_operand.vmem [shape: f32[1,32], index: 6, kind: input, shape index: {}]   ;;  %s1312_s7 = inlined_call_operand.vmem [shape: f32[1,32], index: 7, kind: input, shape index: {}]   ;;  %s1313_s8 = inlined_call_operand.vmem [shape: bf16[32,128], index: 8, kind: input, shape index: {}]   ;;  %s1314_s9 = inlined_call_operand.vmem [shape: f32[1,128], index: 9, kind: input, shape index: {}]   ;;  %s1315_s10 = inlined_call_operand.vmem [shape: bf16[128,32], index: 10, kind: input, shape index: {}]   ;;  %s1316_s11 = inlined_call_operand.vmem [shape: f32[1,32], index: 11, kind: input, shape index: {}]   ;;  %s1317_s12 = inlined_call_operand.vmem [shape: f32[64,32], index: 12, kind: input, shape index: {}]   ;;  %s1318_s13 = inlined_call_operand.vmem [shape: f32[64,16], index: 13, kind: input, shape index: {}]   ;;  %s1319_s14 = inlined_call_operand.hbm [shape: f32[16,32], index: 14, kind: output, shape index: {}]  }
   0x1   :  { %v1067_v0 = vld [vmem:[%s1305_s0] sm:$0xff]  ;;  %v1072_v1 = vld [vmem:[%s1305_s0 + $0x8] sm:$0xff] }
   0x2   :  { %v52_v2 = vsel %vm51_vm0, %v1067_v0, 0.0  ;;  %v55_v3 = vsel %vm51_vm0, %v1072_v1, 0.0 }
   0x3   :  { %53 = vadd.xlane.f32.xlu0 %v52_v2 }
   0x7   :  { %56 = vadd.xlane.f32.xlu0 %v55_v3 }
   0x8   :  { %19 = vsyncpa [#allocation3], 0  ;;  %v906_v14 = vld [vmem:[%s1308_s3 + $0x8] sm:$0xff]   ;;  %v982_v15 = vmov 0.0   ;;  %vm983_vm1 = vmmov 0   ;;  %v907_v16 = vld [vmem:[%s1308_s3] sm:$0xff]  }
   0x9   :  { %834 = vmatprep.subr.bf16.mxu0 %v982_v15  ;;  %838 = vmatprep.mubr.msk.bf16.mxu0 %vm983_vm1, %v982_v15  ;;  %v774_v25 = vld [vmem:[%s1306_s1] ss:$0 sm:$0xff]  ;;  %v1102_v35 = vld [vmem:[%s1317_s12 + $0x10] sm:$0xff]  ;;  %v1117_v39 = vld [vmem:[%s1317_s12 + $0x18] sm:$0xff]  ;;  %vm270_vm2 = vcmask 130048  }
   0xa   :  { %835 = vmatpush3.bf16.msra.mxu0 %v906_v14  ;;  %v775_v29 = vld [vmem:[%s1307_s2] ss:$0 sm:$0xff]  ;;  %v1112_v37 = vld [vmem:[%s1317_s12 + $0x30] sm:$0xff]  ;;  %v1122_v40 = vld [vmem:[%s1317_s12 + $0x28] sm:$0xff] }
   0xb   :  { %836 = vmatprep.subr.bf16.mxu0 %v982_v15  ;;  %v1107_v36 = vld [vmem:[%s1317_s12 + $0x20] sm:$0xff]  ;;  %v1127_v41 = vld [vmem:[%s1317_s12 + $0x38] sm:$0xff]  ;;  %v1137_v43 = vld [vmem:[%s1317_s12 + $0x8] sm:$0xff] }
   0xc   :  { %v1132_v42 = vld [vmem:[%s1317_s12] sm:$0xff]  ;;  %s984_s12 = smov 96   ;;  %v181_v61 = vld [vmem:[%s1318_s13 + $0x10] sm:$0xff] }
   0xd   :  { %v179_v63 = vld [vmem:[%s1318_s13] sm:$0xff] }
   0xe   :  { %837 = vmatpush3.bf16.msra.mxu0 %v907_v16 }
  0x8c   :  { %v54_v4 = vpop.xlane.xlu0 %53 }
  0x8d   :  { %v59_v5 = vmul.f32 0.03125, %v54_v4 }
  0x8f   :  { %v61_v6 = vsub.f32 %v1067_v0, %v59_v5 }
  0x90   :  { %v57_v7 = vpop.xlane.xlu0 %56 }
  0x91   :  { %v60_v8 = vmul.f32 0.03125, %v57_v7  ;;  %v63_v9 = vmul.f32 %v61_v6, %v61_v6 }
  0x93   :  { %v62_v10 = vsub.f32 %v1072_v1, %v60_v8  ;;  %v65_v11 = vsel %vm51_vm0, %v63_v9, 0.0  ;;  %v185_v9 = vld [vmem:[%s1318_s13 + $0x30] sm:$0xff] }
  0x94   :  { %66 = vadd.xlane.f32.xlu1 %v65_v11 }
  0x95   :  { %v64_v12 = vmul.f32 %v62_v10, %v62_v10 }
  0x97   :  { %v68_v13 = vsel %vm51_vm0, %v64_v12, 0.0  ;;  %v180_v12 = vld [vmem:[%s1318_s13 + $0x8] sm:$0xff] }
  0x98   :  { %69 = vadd.xlane.f32.xlu1 %v68_v13 }
 0x11d   :  { %v67_v17 = vpop.xlane.xlu1 %66 }
 0x11e   :  { %v71_v18 = vmul.f32 0.03125, %v67_v17 }
 0x120   :  { %v73_v19 = vadd.f32 1e-05, %v71_v18 }
 0x121   :  { %v70_v20 = vpop.xlane.xlu1 %69 }
 0x122   :  { %920 = vrsqrt.f32 %v73_v19  ;;  %v72_v21 = vmul.f32 0.03125, %v70_v20  ;;  %v183_v20 = vld [vmem:[%s1318_s13 + $0x20] sm:$0xff] }
 0x124   :  { %v74_v22 = vadd.f32 1e-05, %v72_v21 }
 0x126   :  { %922 = vrsqrt.f32 %v74_v22 }
 0x12f   :  { %v921_v23 = vpop.eup %920 }
 0x130   :  { %v77_v24 = vmul.f32 %v921_v23, %v61_v6  ;;  %v182_v6 = vld [vmem:[%s1318_s13 + $0x18] sm:$0xff] }
 0x132   :  { %v86_v28 = vmul.f32 %v774_v25, %v77_v24 }
 0x133   :  { %v923_v26 = vpop.eup %922 }
 0x134   :  { %v78_v27 = vmul.f32 %v923_v26, %v62_v10  ;;  %v95_v31 = vadd.f32 %v775_v29, %v86_v28  ;;  %v186_v28 = vld [vmem:[%s1318_s13 + $0x38] sm:$0xff] }
 0x136   :  { %v87_v30 = vmul.f32 %v774_v25, %v78_v27  ;;  %v184_v25 = vld [vmem:[%s1318_s13 + $0x28] sm:$0xff]  ;;  %s985_s13 = smov 64  }
 0x138   :  { %v96_v32 = vadd.f32 %v775_v29, %v87_v30 }
 0x13a   :  { %v97_v33 = vpack.c.bf16 %v96_v32, %v95_v31 }
 0x13c   :  { %839 = vmatmul.mubr.msk.bf16.vlgmr.msra.gmra.mxu0 %vm51_vm0, %v97_v33 }
 0x1fc   :  { %v151_v34 = vpop.f32.mrf.mxu0 }
 0x1fd   :  { %v168_v44 = vmul.f32 %v1102_v35, %v151_v34  ;;  %v170_v45 = vmul.f32 %v1107_v36, %v151_v34  ;;  %v172_v46 = vmul.f32 %v1112_v37, %v151_v34  ;;  %v166_v53 = vmul.f32 %v1132_v42, %v151_v34 }
 0x1fe   :  { %v840_v38 = vpop.f32.mrf.mxu0 }
 0x200   :  { %v154_v47 = vpop.f32.mrf.mxu0 }
 0x201   :  { %v169_v48 = vmul.f32 %v1117_v39, %v154_v47  ;;  %v171_v49 = vmul.f32 %v1122_v40, %v154_v47  ;;  %v173_v50 = vmul.f32 %v1127_v41, %v154_v47  ;;  %v1145_v51 = vpack.c.bf16 %v154_v47, %v151_v34 }
 0x202   :  { %v841_v52 = vpop.f32.mrf.mxu0  ;;  %v167_v54 = vmul.f32 %v1137_v43, %v154_v47 }
 0x203   :  { %188 = vrot.lane.b32.xlu0 %v1145_v51, %s984_s12  ;;  %v175_v55 = vpack.c.bf16 %v169_v48, %v168_v44  ;;  %v176_v56 = vpack.c.bf16 %v171_v49, %v170_v45  ;;  %v177_v57 = vpack.c.bf16 %v173_v50, %v172_v46 }
 0x204   :  { %v174_v58 = vpack.c.bf16 %v167_v54, %v166_v53 }
 0x206   :  { %844 = vmatprep.mubr.msk.bf16.mxu1 %vm51_vm0, %v174_v58 }
 0x275   :  { %v189_v59 = vpop.permute.xlu0 %188 }
 0x276   :  { %898 = vmatprep.subr.msk.bf16.mxu1 %vm51_vm0, %v189_v59  ;;  %v203_v60 = vsel %vm51_vm0, %v189_v59, 0 }
 0x277   :  { %843 = vmatpush3.bf16.xpose.msra.mxu1 %v203_v60 }
 0x278   :  { %878 = vmatprep.subr.bf16.mxu1 %v982_v15 }
 0x27e   :  { %845 = vmatmul.mubr.msk.bf16.vlgmr.msra.gmra.mxu1 %vm51_vm0, %v175_v55 }
 0x27f   :  { %848 = vmatprep.mubr.msk.bf16.mxu1 %vm51_vm0, %v176_v56 }
 0x286   :  { %849 = vmatmul.mubr.msk.bf16.gmra.mxu1 %vm51_vm0, %v177_v57 }
 0x287   :  { %894 = vmatprep.mubr.msk.bf16.mxu1 %vm983_vm1, %v982_v15 }
 0x33e   :  { %v846_v62 = vpop.f32.mrf.mxu1 }
 0x33f   :  { %v248_v2 = vadd.f32 %v846_v62, %v181_v61 }
 0x340   :  { %v239_v3 = vpop.f32.mrf.mxu1 }
 0x341   :  { %v240_v4 = vadd.f32 %v239_v3, %v179_v63  ;;  %v277_v5 = vsel %vm270_vm2, %v248_v2, -inf }
 0x342   :  { %278 = vmax.xlane.f32.xlu1 %v277_v5  ;;  %v847_v7 = vpop.f32.mrf.mxu1 }
 0x343   :  { %v251_v10 = vadd.f32 %v847_v7, %v182_v6  ;;  %v271_v11 = vsel %vm270_vm2, %v240_v4, -inf }
 0x344   :  { %v242_v8 = vpop.f32.mrf.mxu1 }
 0x345   :  { %v243_v17 = vadd.f32 %v242_v8, %v180_v12  ;;  %v280_v19 = vsel %vm270_vm2, %v251_v10, -inf }
 0x346   :  { %v850_v13 = vpop.f32.mrf.mxu1  ;;  %272 = vmax.xlane.f32.xlu1 %v271_v11 }
 0x347   :  { %v264_v14 = vadd.f32 %v850_v13, %v185_v9  ;;  %v274_v23 = vsel %vm270_vm2, %v243_v17, -inf }
 0x348   :  { %v255_v16 = vpop.f32.mrf.mxu1 }
 0x349   :  { %v289_v18 = vsel %vm270_vm2, %v264_v14, -inf  ;;  %v256_v22 = vadd.f32 %v255_v16, %v183_v20 }
 0x34a   :  { %290 = vmax.xlane.f32.xlu0 %v289_v18  ;;  %v851_v21 = vpop.f32.mrf.mxu1  ;;  %281 = vmax.xlane.f32.xlu1 %v280_v19 }
 0x34b   :  { %v283_v27 = vsel %vm270_vm2, %v256_v22, -inf  ;;  %v267_v29 = vadd.f32 %v851_v21, %v186_v28 }
 0x34c   :  { %v258_v24 = vpop.f32.mrf.mxu1 }
 0x34d   :  { %v259_v26 = vadd.f32 %v258_v24, %v184_v25  ;;  %v292_v31 = vsel %vm270_vm2, %v267_v29, -inf }
 0x34e   :  { %275 = vmax.xlane.f32.xlu1 %v274_v23 }
 0x34f   :  { %v286_v30 = vsel %vm270_vm2, %v259_v26, -inf }
 0x352   :  { %284 = vmax.xlane.f32.xlu1 %v283_v27 }
 0x356   :  { %287 = vmax.xlane.f32.xlu1 %v286_v30 }
 0x35a   :  { %293 = vmax.xlane.f32.xlu1 %v292_v31 }
 0x3cb   :  { %v279_v32 = vpop.xlane.xlu1 %278 }
 0x3cc   :  { %v297_v33 = vsub.f32 %v248_v2, %v279_v32 }
 0x3ce   :  { %v307_v34 = vmul.f32 1.442695, %v297_v33 }
 0x3cf   :  { %v273_v38 = vpop.xlane.xlu1 %272 }
 0x3d0   :  { %924 = vpow2.f32 %v307_v34  ;;  %v295_v44 = vsub.f32 %v240_v4, %v273_v38 }
 0x3d2   :  { %v303_v45 = vmul.f32 1.442695, %v295_v44 }
 0x3d3   :  { %v282_v46 = vpop.xlane.xlu1 %281  ;;  %v291_v47 = vpop.xlane.xlu0 %290 }
 0x3d4   :  { %926 = vpow2.f32 %v303_v45  ;;  %v298_v48 = vsub.f32 %v251_v10, %v282_v46  ;;  %v301_v50 = vsub.f32 %v264_v14, %v291_v47 }
 0x3d6   :  { %v309_v49 = vmul.f32 1.442695, %v298_v48  ;;  %v315_v55 = vmul.f32 1.442695, %v301_v50 }
 0x3d7   :  { %v276_v52 = vpop.xlane.xlu1 %275 }
 0x3d8   :  { %v296_v53 = vsub.f32 %v243_v17, %v276_v52  ;;  %928 = vpow2.f32 %v309_v49 }
 0x3da   :  { %v305_v54 = vmul.f32 1.442695, %v296_v53 }
 0x3db   :  { %v285_v56 = vpop.xlane.xlu1 %284 }
 0x3dc   :  { %930 = vpow2.f32 %v305_v54  ;;  %v299_v57 = vsub.f32 %v256_v22, %v285_v56 }
 0x3dd   :  { %v1191_v58 = vpop.eup %924  ;;  %932 = vpow2.f32 %v315_v55 }
 0x3de   :  { %v325_v59 = vsel %vm270_vm2, %v1191_v58, 0.0  ;;  %v311_v60 = vmul.f32 1.442695, %v299_v57  ;;  %v908_v57 = vld [vmem:[%s1309_s4 + $0x8] sm:$0xff]  }
 0x3df   :  { %326 = vadd.xlane.f32.xlu1 %v325_v59  ;;  %v288_v61 = vpop.xlane.xlu1 %287 }
 0x3e0   :  { %v300_v62 = vsub.f32 %v259_v26, %v288_v61  ;;  %934 = vpow2.f32 %v311_v60 }
 0x3e1   :  { %v927_v63 = vpop.eup %926 }
 0x3e2   :  { %v319_v2 = vsel %vm270_vm2, %v927_v63, 0.0  ;;  %v313_v3 = vmul.f32 1.442695, %v300_v62 }
 0x3e3   :  { %320 = vadd.xlane.f32.xlu1 %v319_v2  ;;  %v294_v4 = vpop.xlane.xlu1 %293 }
 0x3e4   :  { %v302_v5 = vsub.f32 %v267_v29, %v294_v4  ;;  %936 = vpow2.f32 %v313_v3 }
 0x3e5   :  { %v929_v6 = vpop.eup %928 }
 0x3e6   :  { %v317_v7 = vmul.f32 1.442695, %v302_v5  ;;  %v328_v8 = vsel %vm270_vm2, %v929_v6, 0.0 }
 0x3e7   :  { %329 = vadd.xlane.f32.xlu1 %v328_v8 }
 0x3e8   :  { %938 = vpow2.f32 %v317_v7 }
 0x3e9   :  { %v931_v9 = vpop.eup %930 }
 0x3ea   :  { %v322_v10 = vsel %vm270_vm2, %v931_v9, 0.0  ;;  %v933_v11 = vpop.eup %932 }
 0x3eb   :  { %323 = vadd.xlane.f32.xlu1 %v322_v10  ;;  %v337_v12 = vsel %vm270_vm2, %v933_v11, 0.0 }
 0x3ed   :  { %v935_v13 = vpop.eup %934 }
 0x3ee   :  { %v331_v14 = vsel %vm270_vm2, %v935_v13, 0.0 }
 0x3ef   :  { %338 = vadd.xlane.f32.xlu1 %v337_v12 }
 0x3f1   :  { %v937_v16 = vpop.eup %936 }
 0x3f2   :  { %v334_v19 = vsel %vm270_vm2, %v937_v16, 0.0 }
 0x3f3   :  { %332 = vadd.xlane.f32.xlu1 %v331_v14 }
 0x3f5   :  { %v939_v17 = vpop.eup %938 }
 0x3f6   :  { %v340_v18 = vsel %vm270_vm2, %v939_v17, 0.0 }
 0x3f7   :  { %341 = vadd.xlane.f32.xlu0 %v340_v18  ;;  %335 = vadd.xlane.f32.xlu1 %v334_v19 }
 0x408   :  { %363 = vrot.lane.b32.xlu1 %v1145_v51, %s985_s13 }
 0x468   :  { %v327_v20 = vpop.xlane.xlu1 %326 }
 0x46c   :  { %v321_v21 = vpop.xlane.xlu1 %320 }
 0x46d   :  { %940 = vrcp.f32 %v321_v21 }
 0x470   :  { %v330_v22 = vpop.xlane.xlu1 %329 }
 0x471   :  { %942 = vrcp.f32 %v330_v22 }
 0x472   :  { %944 = vrcp.f32 %v327_v20 }
 0x474   :  { %v324_v23 = vpop.xlane.xlu1 %323 }
 0x475   :  { %946 = vrcp.f32 %v324_v23 }
 0x478   :  { %v339_v24 = vpop.xlane.xlu1 %338 }
 0x479   :  { %948 = vrcp.f32 %v339_v24 }
 0x47a   :  { %v941_v26 = vpop.eup %940 }
 0x47b   :  { %v351_v31 = vmul.f32 %v941_v26, %v927_v63 }
 0x47c   :  { %v333_v25 = vpop.xlane.xlu1 %332 }
 0x47d   :  { %950 = vrcp.f32 %v333_v25 }
 0x47e   :  { %v943_v28 = vpop.eup %942 }
 0x47f   :  { %v945_v30 = vpop.eup %944  ;;  %v354_v33 = vmul.f32 %v943_v28, %v929_v6 }
 0x480   :  { %v342_v27 = vpop.xlane.xlu0 %341  ;;  %v336_v29 = vpop.xlane.xlu1 %335  ;;  %v353_v44 = vmul.f32 %v945_v30, %v1191_v58  ;;  %v909_v58 = vld [vmem:[%s1309_s4] sm:$0xff]  }
 0x481   :  { %952 = vrcp.f32 %v342_v27 }
 0x482   :  { %954 = vrcp.f32 %v336_v29  ;;  %v947_v51 = vpop.eup %946  ;;  %v360_v45 = vpack.c.bf16 %v354_v33, %v353_v44  ;;  %v912_v33 = vld [vmem:[%s1315_s10 + $0x38] sm:$0xff]   ;;  %v915_v44 = vld [vmem:[%s1315_s10 + $0x20] sm:$0xff]  }
 0x483   :  { %v352_v32 = vmul.f32 %v947_v51, %v931_v9  ;;  %879 = vmatpush3.bf16.msra.mxu1 %v912_v33 }
 0x484   :  { %v364_v34 = vpop.permute.xlu1 %363  ;;  %880 = vmatprep.subr.bf16.mxu1 %v982_v15 }
 0x485   :  { %852 = vmatprep.subr.bf16.mxu0 %v364_v34  ;;  %v359_v38 = vpack.c.bf16 %v352_v32, %v351_v31  ;;  %v910_v31 = vld [vmem:[%s1313_s8 + $0x8] sm:$0xff]   ;;  %v911_v32 = vld [vmem:[%s1313_s8] sm:$0xff]  }
 0x486   :  { %853 = vmatpush3.bf16.msra.mxu0 %v364_v34  ;;  %v949_v46 = vpop.eup %948  ;;  %v913_v34 = vld [vmem:[%s1315_s10 + $0x30] sm:$0xff]  }
 0x487   :  { %854 = vmatprep.mubr.msk.bf16.mxu0 %vm270_vm2, %v359_v38  ;;  %862 = vmatprep.subr.bf16.mxu0 %v982_v15  ;;  %v357_v50 = vmul.f32 %v949_v46, %v933_v11  ;;  %v914_v38 = vld [vmem:[%s1315_s10 + $0x28] sm:$0xff]  }
 0x488   :  { %881 = vmatpush3.bf16.msra.mxu1 %v913_v34 }
 0x489   :  { %855 = vmatmul.mubr.msk.bf16.vlgmr.msra.gmra.mxu0 %vm270_vm2, %v360_v45  ;;  %882 = vmatprep.subr.bf16.mxu1 %v982_v15  ;;  %v916_v45 = vld [vmem:[%s1315_s10 + $0x18] sm:$0xff]  }
 0x48a   :  { %v951_v47 = vpop.eup %950  ;;  %863 = vmatpush3.bf16.msra.mxu0 %v908_v57 }
 0x48b   :  { %v355_v53 = vmul.f32 %v951_v47, %v935_v13  ;;  %864 = vmatprep.subr.bf16.mxu0 %v982_v15 }
 0x48c   :  { %883 = vmatpush3.bf16.msra.mxu1 %v914_v38 }
 0x48d   :  { %884 = vmatprep.subr.bf16.mxu1 %v982_v15 }
 0x48e   :  { %v953_v48 = vpop.eup %952  ;;  %865 = vmatpush3.bf16.msra.mxu0 %v909_v58 }
 0x48f   :  { %v955_v49 = vpop.eup %954  ;;  %v358_v52 = vmul.f32 %v953_v48, %v939_v17  ;;  %870 = vmatprep.subr.bf16.mxu0 %v982_v15 }
 0x490   :  { %v356_v54 = vmul.f32 %v955_v49, %v937_v16  ;;  %885 = vmatpush3.bf16.msra.mxu1 %v915_v44 }
 0x491   :  { %v362_v55 = vpack.c.bf16 %v358_v52, %v357_v50  ;;  %886 = vmatprep.subr.bf16.mxu1 %v982_v15 }
 0x492   :  { %v361_v56 = vpack.c.bf16 %v356_v54, %v355_v53 }
 0x494   :  { %858 = vmatprep.mubr.msk.bf16.mxu0 %vm270_vm2, %v361_v56  ;;  %887 = vmatpush3.bf16.msra.mxu1 %v916_v45 }
 0x495   :  { %859 = vmatmul.mubr.msk.bf16.gmra.mxu0 %vm270_vm2, %v362_v55  ;;  %888 = vmatprep.subr.bf16.mxu1 %v982_v15  ;;  %v791_v55 = vld [vmem:[%s1311_s6] ss:$0 sm:$0xff] }
 0x496   :  { %866 = vmatprep.mubr.msk.bf16.mxu0 %vm983_vm1, %v982_v15 }
 0x549   :  { %v856_v59 = vpop.f32.mrf.mxu0 }
 0x54a   :  { %v445_v4 = vmul.f32 %v856_v59, %v1102_v35  ;;  %v792_v59 = vld [vmem:[%s1312_s7] ss:$0 sm:$0xff] }
 0x54b   :  { %v412_v60 = vpop.f32.mrf.mxu0 }
 0x54c   :  { %v443_v2 = vmul.f32 %v412_v60, %v1132_v42 }
 0x54d   :  { %v857_v61 = vpop.f32.mrf.mxu0 }
 0x54e   :  { %v451_v8 = vadd.f32 %v445_v4, %v443_v2  ;;  %v446_v9 = vmul.f32 %v857_v61, %v1117_v39  ;;  %v917_v2 = vld [vmem:[%s1315_s10 + $0x10] sm:$0xff]   ;;  %v919_v4 = vld [vmem:[%s1315_s10] sm:$0xff]  }
 0x54f   :  { %v415_v62 = vpop.f32.mrf.mxu0  ;;  %889 = vmatpush3.bf16.msra.mxu1 %v917_v2 }
 0x550   :  { %v444_v5 = vmul.f32 %v415_v62, %v1137_v43  ;;  %890 = vmatprep.subr.bf16.mxu1 %v982_v15 }
 0x552   :  { %v452_v11 = vadd.f32 %v446_v9, %v444_v5  ;;  %v793_v5 = vld [vmem:[%s1314_s9] ss:$0 sm:$0xff]  ;;  %s986_s9 = smov [#allocation2]  }
 0x555   :  { %v860_v63 = vpop.f32.mrf.mxu0 }
 0x556   :  { %v449_v14 = vmul.f32 %v860_v63, %v1112_v37 }
 0x557   :  { %v428_v3 = vpop.f32.mrf.mxu0 }
 0x558   :  { %v447_v6 = vmul.f32 %v428_v3, %v1107_v36  ;;  %v787_v36 = vld [vmem:[%s1310_s5] ss:$0 sm:$0xff]  ;;  %v918_v3 = vld [vmem:[%s1315_s10 + $0x8] sm:$0xff]   ;;  %s763_s10 = sshll.u32 %s986_s9, 4  ;;  %s764_s10 = int_to_ptr.vmem [resolvable:$true] %s763_s10 }
 0x559   :  { %v861_v7 = vpop.f32.mrf.mxu0  ;;  %891 = vmatpush3.bf16.msra.mxu1 %v918_v3  ;;  %s960_s20 = scalar_lea.vmem %s764_s10, 256  ;;  %p965_p1 = scmp.lt.s32.totalorder %s764_s10, %s764_s10 }
 0x55a   :  { %v453_v12 = vadd.f32 %v451_v8, %v447_v6  ;;  %v450_v42 = vmul.f32 %v861_v7, %v1127_v41  ;;  %892 = vmatprep.subr.bf16.mxu1 %v982_v15  ;;  %p961_p0 = scmp.ne.s32.totalorder %s764_s10, %s960_s20  ;;  %p966_p2 = scmp.lt.s32.totalorder %s960_s20, %s960_s20 }
 0x55b   :  { %v431_v10 = vpop.f32.mrf.mxu0 }
 0x55c   :  { %v448_v13 = vmul.f32 %v431_v10, %v1122_v40  ;;  %v455_v17 = vadd.f32 %v453_v12, %v449_v14  ;;  %p967_p3 = por %p966_p2, %p965_p1 }
 0x55d   :  { %893 = vmatpush3.bf16.msra.mxu1 %v919_v4 }
 0x55e   :  { %v454_v16 = vadd.f32 %v452_v11, %v448_v13  ;;  %p968_p4 = pnand %p967_p3, %p961_p0 }
 0x560   :  { %v456_v35 = vadd.f32 %v454_v16, %v450_v42 }
 0x562   :  { %v457_v18 = vpack.c.bf16 %v456_v35, %v455_v17 }
 0x564   :  { %867 = vmatmul.mubr.msk.bf16.vlgmr.msra.gmra.mxu0 %vm51_vm0, %v457_v18 }
 0x565   :  { %874 = vmatprep.mubr.msk.bf16.mxu0 %vm983_vm1, %v982_v15  ;;  %871 = vmatpush3.bf16.msra.mxu0 %v910_v31 }
 0x566   :  { %872 = vmatprep.subr.bf16.mxu0 %v982_v15  ;;  %v797_v15 = vld [vmem:[%s1316_s11] ss:$0 sm:$0xff] }
 0x569   :  { %873 = vmatpush3.bf16.msra.mxu0 %v911_v32 }
 0x624   :  { %v518_v39 = vpop.f32.mrf.mxu0 }
 0x625   :  { %v519_v43 = vadd.f32 %v787_v36, %v518_v39 }
 0x626   :  { %v868_v40 = vpop.f32.mrf.mxu0 }
 0x627   :  { %v1234_v37 = vadd.f32 %v519_v43, %v1067_v0 }
 0x628   :  { %v521_v41 = vpop.f32.mrf.mxu0 }
 0x629   :  { %v522_v19 = vadd.f32 %v787_v36, %v521_v41  ;;  %v527_v20 = vsel %vm51_vm0, %v1234_v37, 0.0 }
 0x62a   :  { %528 = vadd.xlane.f32.xlu0 %v527_v20  ;;  %v869_v21 = vpop.f32.mrf.mxu0 }
 0x62b   :  { %v1239_v22 = vadd.f32 %v522_v19, %v1072_v1 }
 0x62d   :  { %v530_v23 = vsel %vm51_vm0, %v1239_v22, 0.0 }
 0x62e   :  { %531 = vadd.xlane.f32.xlu0 %v530_v23 }
 0x6b3   :  { %v529_v24 = vpop.xlane.xlu0 %528 }
 0x6b4   :  { %v533_v25 = vmul.f32 0.03125, %v529_v24 }
 0x6b6   :  { %v535_v26 = vsub.f32 %v1234_v37, %v533_v25 }
 0x6b7   :  { %v532_v0 = vpop.xlane.xlu0 %531 }
 0x6b8   :  { %v534_v27 = vmul.f32 0.03125, %v532_v0  ;;  %v537_v28 = vmul.f32 %v535_v26, %v535_v26 }
 0x6ba   :  { %v536_v29 = vsub.f32 %v1239_v22, %v534_v27  ;;  %v539_v30 = vsel %vm51_vm0, %v537_v28, 0.0 }
 0x6bb   :  { %540 = vadd.xlane.f32.xlu0 %v539_v30 }
 0x6bc   :  { %v538_v51 = vmul.f32 %v536_v29, %v536_v29 }
 0x6be   :  { %v542_v1 = vsel %vm51_vm0, %v538_v51, 0.0 }
 0x6bf   :  { %543 = vadd.xlane.f32.xlu0 %v542_v1 }
 0x744   :  { %v541_v46 = vpop.xlane.xlu0 %540 }
 0x745   :  { %v545_v47 = vmul.f32 0.03125, %v541_v46 }
 0x747   :  { %v547_v48 = vadd.f32 1e-05, %v545_v47 }
 0x748   :  { %v544_v49 = vpop.xlane.xlu0 %543 }
 0x749   :  { %956 = vrsqrt.f32 %v547_v48  ;;  %v546_v50 = vmul.f32 0.03125, %v544_v49 }
 0x74b   :  { %v548_v52 = vadd.f32 1e-05, %v546_v50 }
 0x74d   :  { %958 = vrsqrt.f32 %v548_v52 }
 0x756   :  { %v957_v53 = vpop.eup %956 }
 0x757   :  { %v551_v54 = vmul.f32 %v957_v53, %v535_v26 }
 0x759   :  { %v560_v58 = vmul.f32 %v791_v55, %v551_v54 }
 0x75a   :  { %v959_v56 = vpop.eup %958 }
 0x75b   :  { %v552_v57 = vmul.f32 %v959_v56, %v536_v29  ;;  %v569_v61 = vadd.f32 %v792_v59, %v560_v58 }
 0x75d   :  { %v561_v60 = vmul.f32 %v791_v55, %v552_v57 }
 0x75f   :  { %v570_v62 = vadd.f32 %v792_v59, %v561_v60 }
 0x761   :  { %v571_v63 = vpack.c.bf16 %v570_v62, %v569_v61 }
 0x763   :  { %875 = vmatmul.mubr.msk.bf16.vlgmr.msra.gmra.mxu0 %vm51_vm0, %v571_v63 }
 0x823   :  { %v632_v6 = vpop.f32.mrf.mxu0 }
 0x824   :  { %v633_v8 = vadd.f32 %v793_v5, %v632_v6 }
 0x825   :  { %v876_v7 = vpop.f32.mrf.mxu0 }
 0x826   :  { %v639_v12 = vmax.f32 %v633_v8, 0.0 }
 0x827   :  { %v635_v9 = vpop.f32.mrf.mxu0 }
 0x828   :  { %v636_v10 = vadd.f32 %v793_v5, %v635_v9 }
 0x829   :  { %v877_v11 = vpop.f32.mrf.mxu0 }
 0x82a   :  { %v640_v13 = vmax.f32 %v636_v10, 0.0 }
 0x82c   :  { %v641_v14 = vpack.c.bf16 %v640_v13, %v639_v12 }
 0x82e   :  { %895 = vmatmul.mubr.bf16.vlgmr.msra.gmra.mxu1 %v641_v14 }
 0x8ee   :  { %v747_v42 = vpop.f32.mrf.mxu1 }
 0x8ef   :  { %v748_v16 = vadd.f32 %v797_v15, %v747_v42 }
 0x8f0   :  { %v896_v17 = vpop.f32.mrf.mxu1 }
 0x8f1   :  { %v754_v35 = vadd.f32 %v748_v16, %v1234_v37 }
 0x8f2   :  { %v750_v18 = vpop.f32.mrf.mxu1 }
 0x8f3   :  { %756 = vst.msk [vmem:[#allocation2] sm:$0xff] %vm51_vm0, %v754_v35  ;;  %v751_v36 = vadd.f32 %v797_v15, %v750_v18 }
 0x8f4   :  { %v897_v39 = vpop.f32.mrf.mxu1 }
 0x8f5   :  { %v755_v43 = vadd.f32 %v751_v36, %v1239_v22 }
 0x8f7   :  { %757 = vst.msk [vmem:[#allocation2 + $0x8] sm:$0xff] %vm51_vm0, %v755_v43 }
 0x8f8   :  { %971 = shalt.err (!%p968_p4)
}
 0x8f9   :  { %s987_s11 = smov 128   ;;  %s988_s21 = smov 8  }
 0x8fa   :  { %769 = dma.vmem_to_hbm [thread:$0]  %s764_s10, 256, %s1319_s14, [#allocation3], %s987_s11, %s987_s11, %s988_s21  }
 0x8fb   :  { %980 = dma.done.wait [#allocation3], 256  }
 0x8fc   :  { %981 = vsyncadd [#allocation3], 4294967040 }
 0x8fd   :  { %773 = vsyncpa [#allocation3], 1 }

</bundles_post_ra>
